<compile_context>
chip_gen: v5e
topology: v5e:2x2
jax: 0.10.0
libtpu: 0.0.40
codegen_flags: <defaults>
</compile_context>

<pallas_src>
import numpy as np
import jax
import jax.numpy as jnp
from jax.experimental import pallas as pl
from jax.experimental.pallas import tpu as pltpu

_VMEM_LIMIT_BYTES = 48 * 1024 * 1024


# ----------------------------------------------------------------------------
# small helpers
# ----------------------------------------------------------------------------
def _round_up(x, m):
    return ((x + m - 1) // m) * m


def _pad_blocks(a, axis, blk, blk_p):
    """Zero-pad every contiguous block of size `blk` along `axis` to size `blk_p`."""
    a = np.asarray(a, np.float32)
    if blk == blk_p:
        return a
    n = a.shape[axis] // blk
    a = np.moveaxis(a, axis, -1)
    lead = a.shape[:-1]
    a = a.reshape(lead + (n, blk))
    a = np.pad(a, [(0, 0)] * (a.ndim - 1) + [(0, blk_p - blk)])
    a = a.reshape(lead + (n * blk_p,))
    return np.moveaxis(a, -1, axis)


def _pick_tile(n, cands):
    for c in cands:
        if n % c == 0:
            return c
    return n


def _pick_batch_tile(B):
    # Large tiles feed the MXU in the per-step (tb, Hp) @ (Hp, 3Hp) matmul; when B is
    # large enough keep >= 2 batch blocks so the "parallel" axis can shard across the
    # two v7x TensorCores.
    for cand in (256, 128):
        if B % cand == 0 and B // cand >= 2:
            return cand
    for cand in (256, 128, 64, 32, 16, 8):
        if B % cand == 0:
            return cand
    return B


# ----------------------------------------------------------------------------
# Kernel 1: hoisted input projection  gx = sum_i x_i @ W_i + b   (MXU, bf16, M/N tiled)
# ----------------------------------------------------------------------------
def _make_proj_kernel(n_in):
    def kernel(*refs):
        xs = refs[:n_in]
        ws = refs[n_in:2 * n_in]
        b_ref = refs[2 * n_in]
        o_ref = refs[2 * n_in + 1]
        acc = jnp.dot(xs[0][...], ws[0][...], preferred_element_type=jnp.float32)
        for i in range(1, n_in):
            acc = acc + jnp.dot(xs[i][...], ws[i][...],
                                preferred_element_type=jnp.float32)
        o_ref[...] = (acc + b_ref[...]).astype(o_ref.dtype)
    return kernel


def _input_projection(xs, ws, bias):
    """xs[i]: (M, Din_i) bf16, ws[i]: (Din_i, G) bf16, bias: (1, G) f32 -> (M, G) bf16."""
    M = xs[0].shape[0]
    G = ws[0].shape[1]
    n_in = len(xs)
    tm = _pick_tile(M, (512, 256, 128, 64, 32, 16, 8))
    tn = _pick_tile(G, (1024, 512, 256, 128))

    in_specs = []
    for x in xs:
        din = x.shape[1]
        in_specs.append(pl.BlockSpec((tm, din), lambda i, j: (i, 0)))
    for w in ws:
        din = w.shape[0]
        in_specs.append(pl.BlockSpec((din, tn), lambda i, j: (0, j)))
    in_specs.append(pl.BlockSpec((1, tn), lambda i, j: (0, j)))

    return pl.pallas_call(
        _make_proj_kernel(n_in),
        out_shape=jax.ShapeDtypeStruct((M, G), jnp.bfloat16),
        grid_spec=pltpu.PrefetchScalarGridSpec(
            num_scalar_prefetch=0,
            grid=(M // tm, G // tn),
            in_specs=in_specs,
            out_specs=pl.BlockSpec((tm, tn), lambda i, j: (i, j))),
        compiler_params=pltpu.CompilerParams(
            dimension_semantics=("parallel", "parallel"),
            vmem_limit_bytes=_VMEM_LIMIT_BYTES),
    )(*xs, *ws, bias)


# ----------------------------------------------------------------------------
# Kernel 2: streamed GRU recurrence.  grid = (batch_tiles, T); T is sequential,
# hidden state carried in VMEM scratch; fwd processes timestep t, bwd processes T-1-t.
# ----------------------------------------------------------------------------
def _make_gru_step_kernel(H, bi):
    H3 = 3 * H

    def dir_step(lens, gx_ref, whh_ref, bhhn_ref, h_ref, out_ref, tt):
        gx = gx_ref[0].astype(jnp.float32)                    # (tb, 3H)
        h = h_ref[...]                                        # (tb, H) f32 carry
        gh = jnp.dot(h.astype(jnp.bfloat16), whh_ref[...],
                     preferred_element_type=jnp.float32)      # (tb, 3H)
        r = jax.nn.sigmoid(gx[:, 0:H] + gh[:, 0:H])           # b_hh_r folded into gx
        z = jax.nn.sigmoid(gx[:, H:2 * H] + gh[:, H:2 * H])   # b_hh_z folded into gx
        n = jnp.tanh(gx[:, 2 * H:H3] + r * (gh[:, 2 * H:H3] + bhhn_ref[...]))
        h_cand = z * (h - n) + n                              # == (1 - z) * n + z * h
        valid = lens > tt                                     # (tb, 1) bool
        out_ref[0] = jnp.where(valid, h_cand, 0.0).astype(out_ref.dtype)
        h_ref[...] = jnp.where(valid, h_cand, h)

    if bi:
        def kernel(lens_ref, gxf_ref, gxb_ref, whhf_ref, bhhnf_ref,
                   whhb_ref, bhhnb_ref, outf_ref, outb_ref, hf_ref, hb_ref):
            t = pl.program_id(1)
            nt = pl.num_programs(1)

            @pl.when(t == 0)
            def _():
                hf_ref[...] = jnp.zeros_like(hf_ref)
                hb_ref[...] = jnp.zeros_like(hb_ref)

            lens = lens_ref[...]
            dir_step(lens, gxf_ref, whhf_ref, bhhnf_ref, hf_ref, outf_ref, t)
            dir_step(lens, gxb_ref, whhb_ref, bhhnb_ref, hb_ref, outb_ref, nt - 1 - t)
    else:
        def kernel(lens_ref, gxf_ref, whhf_ref, bhhnf_ref, outf_ref, hf_ref):
            t = pl.program_id(1)

            @pl.when(t == 0)
            def _():
                hf_ref[...] = jnp.zeros_like(hf_ref)

            lens = lens_ref[...]
            dir_step(lens, gxf_ref, whhf_ref, bhhnf_ref, hf_ref, outf_ref, t)

    return kernel


def _run_gru_layer(gx, lens2d, whh_list, bhhn_list, *, hidden, bi, last, tb):
    T, B, _ = gx.shape
    H = hidden
    H3 = 3 * H
    ndir = 2 if bi else 1
    out_dtype = jnp.float32 if last else jnp.bfloat16   # bf16 intermediates halve HBM traffic

    in_specs = [pl.BlockSpec((tb, 1), lambda b, t: (b, 0)),               # lengths
                pl.BlockSpec((1, tb, H3), lambda b, t: (t, b, 0))]        # gx, fwd columns
    args = [lens2d, gx]
    if bi:
        # same gx array, backward direction reads timestep T-1-t, column block 1
        in_specs.append(pl.BlockSpec((1, tb, H3), lambda b, t: (T - 1 - t, b, 1)))
        args.append(gx)
    for d in range(ndir):
        in_specs += [pl.BlockSpec((H, H3), lambda b, t: (0, 0)),          # W_hh^T (resident)
                     pl.BlockSpec((1, H), lambda b, t: (0, 0))]           # b_hh (n gate only)
        args += [whh_list[d], bhhn_list[d]]

    out_shape = [jax.ShapeDtypeStruct((T, B, H), out_dtype)]
    out_specs = [pl.BlockSpec((1, tb, H), lambda b, t: (t, b, 0))]
    if bi:
        out_shape.append(jax.ShapeDtypeStruct((T, B, H), out_dtype))
        out_specs.append(pl.BlockSpec((1, tb, H), lambda b, t: (T - 1 - t, b, 0)))

    outs = pl.pallas_call(
        _make_gru_step_kernel(H, bi),
        out_shape=tuple(out_shape) if bi else out_shape[0],
        grid_spec=pltpu.PrefetchScalarGridSpec(
            num_scalar_prefetch=0,
            grid=(B // tb, T),
            in_specs=in_specs,
            out_specs=out_specs if bi else out_specs[0],
            scratch_shapes=[pltpu.VMEM((tb, H), jnp.float32) for _ in range(ndir)]),
        compiler_params=pltpu.CompilerParams(
            dimension_semantics=("parallel", "arbitrary"),
            vmem_limit_bytes=_VMEM_LIMIT_BYTES),
    )(*args)
    return list(outs) if bi else [outs]


# ----------------------------------------------------------------------------
# Kernel 3: finalize (fwd/bwd average + l2norm), lane-dense output
# ----------------------------------------------------------------------------
def _make_finalize_kernel(bi, no_txtnorm, eps=1e-8):
    def kernel(*refs):
        if bi:
            f_ref, b_ref, o_ref = refs
            x = (f_ref[...].astype(jnp.float32) + b_ref[...].astype(jnp.float32)) * 0.5
        else:
            f_ref, o_ref = refs
            x = f_ref[...].astype(jnp.float32)
        if not no_txtnorm:
            ss = jnp.sum(x * x, axis=-1, keepdims=True)
            x = x * pl.reciprocal(jnp.sqrt(ss) + eps, approx=True)
        o_ref[...] = x
    return kernel


def _finalize(xs, H, *, bi, no_txtnorm):
    M = xs[0].shape[0]
    tm = _pick_tile(M, (512, 256, 128, 64, 32, 16, 8))
    n_in = 2 if bi else 1
    in_specs = [pl.BlockSpec((tm, H), lambda i: (i, 0)) for _ in range(n_in)]
    return pl.pallas_call(
        _make_finalize_kernel(bi, no_txtnorm),
        out_shape=jax.ShapeDtypeStruct((M, H), jnp.float32),
        grid_spec=pltpu.PrefetchScalarGridSpec(
            num_scalar_prefetch=0,
            grid=(M // tm,),
            in_specs=in_specs,
            out_specs=pl.BlockSpec((tm, H), lambda i: (i, 0))),
        compiler_params=pltpu.CompilerParams(
            dimension_semantics=("parallel",),
            vmem_limit_bytes=_VMEM_LIMIT_BYTES),
    )(*xs[:n_in])


# ----------------------------------------------------------------------------
# Module wrapper
# ----------------------------------------------------------------------------
class EncoderTextPallas:
    def __init__(self, word_dim, embed_size, num_layers, use_bi_gru=False,
                 no_txtnorm=False, vocab_size=64, seed=0):
        self.word_dim = word_dim
        self.embed_size = embed_size
        self.num_layers = num_layers
        self.use_bi_gru = use_bi_gru
        self.no_txtnorm = no_txtnorm
        self.hidden_p = _round_up(embed_size, 128)
        self.word_dim_p = _round_up(word_dim, 128)

        key = jax.random.PRNGKey(seed)
        params = {}
        # TODO(synk): Bert_Embeddings is an external module with no definition in the
        # spec; approximated by a deterministic learned embedding-table lookup.
        key, k = jax.random.split(key)
        params["emb"] = jax.random.normal(k, (vocab_size, word_dim), jnp.float32) * 0.1

        ndir = 2 if use_bi_gru else 1
        H = embed_size
        bound = 1.0 / np.sqrt(H)
        for layer in range(num_layers):
            d_in = word_dim if layer == 0 else H * ndir
            for d in range(ndir):
                for name, shape in (("w_ih", (3 * H, d_in)),
                                    ("w_hh", (3 * H, H)),
                                    ("b_ih", (3 * H,)),
                                    ("b_hh", (3 * H,))):
                    key, k = jax.random.split(key)
                    params[f"{name}_{layer}_{d}"] = jax.random.uniform(
                        k, shape, jnp.float32, -bound, bound)
        self.params = params

        # ---- kernel-ready params: per-gate / per-input-chunk zero-padded to Hp/Dp
        # (multiples of 128), transposed for the matmuls, weights in bf16, r/z b_hh
        # folded into b_ih. Padded lanes provably stay exactly 0 through the GRU.
        Hp, Dp = self.hidden_p, self.word_dim_p
        kp = {}
        emb_p = np.pad(np.asarray(params["emb"], np.float32),
                       ((0, 0), (0, Dp - word_dim)))
        kp["emb_p"] = jnp.asarray(emb_p, jnp.bfloat16)      # bf16 + lane-padded table

        for layer in range(num_layers):
            n_chunks = 1 if layer == 0 else ndir
            chunk_in = word_dim if layer == 0 else H
            chunk_in_p = Dp if layer == 0 else Hp
            w_parts = [[] for _ in range(n_chunks)]
            b_cols = []
            for d in range(ndir):
                wih = np.asarray(params[f"w_ih_{layer}_{d}"], np.float32)
                whh = np.asarray(params[f"w_hh_{layer}_{d}"], np.float32)
                bih = np.asarray(params[f"b_ih_{layer}_{d}"], np.float32).copy()
                bhh = np.asarray(params[f"b_hh_{layer}_{d}"], np.float32)
                bih[:2 * H] += bhh[:2 * H]        # fold b_hh of r/z gates into b_ih
                wih_p = _pad_blocks(_pad_blocks(wih, 0, H, Hp), 1, chunk_in, chunk_in_p)
                whh_p = _pad_blocks(_pad_blocks(whh, 0, H, Hp), 1, H, Hp)
                bih_p = _pad_blocks(bih, 0, H, Hp)
                bhh_n_p = np.pad(bhh[2 * H:3 * H], (0, Hp - H))
                for c in range(n_chunks):
                    w_parts[c].append(wih_p[:, c * chunk_in_p:(c + 1) * chunk_in_p].T)
                b_cols.append(bih_p)
                kp[f"whh_t_{layer}_{d}"] = jnp.asarray(whh_p.T, jnp.bfloat16)
                kp[f"bhh_n_{layer}_{d}"] = jnp.asarray(bhh_n_p, jnp.float32)[None, :]
            kp[f"wih_parts_{layer}"] = [
                jnp.asarray(np.concatenate(w_parts[c], axis=1), jnp.bfloat16)
                for c in range(n_chunks)]
            kp[f"bih_fold_{layer}"] = jnp.asarray(
                np.concatenate(b_cols, axis=0), jnp.float32)[None, :]
        self.kparams = kp

    def __call__(self, ids, lengths):
        """ids: (B, T) int32, lengths: (B,) int32. Returns (cap_emb (B,T,H), cap_len)."""
        H, Hp = self.embed_size, self.hidden_p
        ndir = 2 if self.use_bi_gru else 1
        B, T = ids.shape

        # embedding gather (JAX glue); table already bf16 + lane-padded -> no extra cast
        x = jnp.take(self.kparams["emb_p"], ids, axis=0)        # (B, T, Dp) bf16
        x_tm = jnp.transpose(x, (1, 0, 2))                      # (T, B, Dp) time-major
        lens2d = lengths.astype(jnp.int32).reshape(B, 1)
        tb = _pick_batch_tile(B)

        xs = [x_tm.reshape(T * B, -1)]
        for layer in range(self.num_layers):
            last = layer == self.num_layers - 1
            gx = _input_projection(xs, self.kparams[f"wih_parts_{layer}"],
                                   self.kparams[f"bih_fold_{layer}"])
            gx = gx.reshape(T, B, 3 * Hp * ndir)
            outs = _run_gru_layer(
                gx, lens2d,
                [self.kparams[f"whh_t_{layer}_{d}"] for d in range(ndir)],
                [self.kparams[f"bhh_n_{layer}_{d}"] for d in range(ndir)],
                hidden=Hp, bi=self.use_bi_gru, last=last, tb=tb)
            xs = [o.reshape(T * B, Hp) for o in outs]

        if self.use_bi_gru or not self.no_txtnorm:
            cap_flat = _finalize(xs, Hp, bi=self.use_bi_gru, no_txtnorm=self.no_txtnorm)
        else:
            cap_flat = xs[0]                                    # last layer already f32
        cap_tm = cap_flat.reshape(T, B, Hp)
        # TODO(synk): final time-major -> batch-first transpose kept as JAX glue.
        cap_emb = jnp.transpose(cap_tm[:, :, :H], (1, 0, 2))    # (B, T, H)
        return cap_emb, lengths


# ----------------------------------------------------------------------------
# Pure-numpy reference (mirrors PyTorch EncoderText.forward semantics, f32)
# ----------------------------------------------------------------------------
def _sigmoid(x):
    return 1.0 / (1.0 + np.exp(-x))


def reference_forward(ids, lengths, enc: EncoderTextPallas):
    p = {k: np.asarray(v) for k, v in enc.params.items()}
    H = enc.embed_size
    x = p["emb"][np.asarray(ids)]                                # (B, T, D)
    B, T, _ = x.shape
    ndir = 2 if enc.use_bi_gru else 1
    inp = x.astype(np.float32)
    per_dir = None
    for layer in range(enc.num_layers):
        per_dir = []
        for d in range(ndir):
            wih, whh = p[f"w_ih_{layer}_{d}"], p[f"w_hh_{layer}_{d}"]
            bih, bhh = p[f"b_ih_{layer}_{d}"], p[f"b_hh_{layer}_{d}"]
            out = np.zeros((B, T, H), np.float32)
            for b in range(B):
                L = int(lengths[b])
                h = np.zeros(H, np.float32)
                trange = range(L - 1, -1, -1) if d == 1 else range(L)
                for t in trange:
                    gx = wih @ inp[b, t] + bih
                    gh = whh @ h + bhh
                    r = _sigmoid(gx[:H] + gh[:H])
                    z = _sigmoid(gx[H:2 * H] + gh[H:2 * H])
                    n = np.tanh(gx[2 * H:] + r * gh[2 * H:])
                    h = (1.0 - z) * n + z * h
                    out[b, t] = h
            per_dir.append(out)
        inp = np.concatenate(per_dir, -1) if enc.use_bi_gru else per_dir[0]
    cap = (per_dir[0] + per_dir[1]) / 2.0 if enc.use_bi_gru else per_dir[0]
    if not enc.no_txtnorm:
        norm = np.sqrt((cap ** 2).sum(-1, keepdims=True)) + 1e-8
        cap = cap / norm
    return cap


# ----------------------------------------------------------------------------
if __name__ == "__main__":
    word_dim, vocab = 32, 50
    B, T = 2, 8

    key = jax.random.PRNGKey(0)
    kid, _ = jax.random.split(key)
    ids = jax.random.randint(kid, (B, T), 0, vocab, dtype=jnp.int32)
    lengths = jnp.array([8, 5], dtype=jnp.int32)   # sorted decreasing (packing requirement)

    configs = [
        dict(embed_size=32, num_layers=1, use_bi_gru=True, no_txtnorm=False),
        dict(embed_size=32, num_layers=2, use_bi_gru=True, no_txtnorm=True),
        dict(embed_size=32, num_layers=1, use_bi_gru=False, no_txtnorm=False),
    ]

    for cfg in configs:
        enc = EncoderTextPallas(word_dim, cfg["embed_size"], cfg["num_layers"],
                                use_bi_gru=cfg["use_bi_gru"],
                                no_txtnorm=cfg["no_txtnorm"],
                                vocab_size=vocab, seed=0)
        cap_emb, cap_len = enc(ids, lengths)
        cap_emb = jax.block_until_ready(cap_emb)

        ref = reference_forward(np.asarray(ids), np.asarray(lengths), enc)
        # bf16 MXU matmuls / bf16 intermediates -> looser tolerance than pure-f32
        np.testing.assert_allclose(np.asarray(cap_emb), ref, rtol=2e-2, atol=2e-2)
        assert cap_emb.shape == (B, T, cfg["embed_size"])
        assert np.array_equal(np.asarray(cap_len), np.asarray(lengths))

    print("KERNEL_OK")
</pallas_src>

<mosaic_0001>
module attributes {stable_mosaic.version = 11 : i64} {
  func.func @kernel(%arg0: i32, %arg1: i32, %arg2: memref<16x128xbf16, #tpu.memory_space<vmem>>, %arg3: memref<128x256xbf16, #tpu.memory_space<vmem>>, %arg4: memref<1x256xf32, #tpu.memory_space<vmem>>, %arg5: memref<16x256xbf16, #tpu.memory_space<vmem>>) attributes {dimension_semantics = [#tpu.dimension_semantics<parallel>, #tpu.dimension_semantics<parallel>], iteration_bounds = array<i64: 1, 3>, scalar_prefetch = 0 : i64, scratch_operands = 0 : i64, tpu.core_type = #tpu.core_type<tc>, window_params = [{transform_indices = @transform_0, window_bounds = array<i64: 16, 128>}, {transform_indices = @transform_1, window_bounds = array<i64: 128, 256>}, {transform_indices = @transform_2, window_bounds = array<i64: 1, 256>}, {transform_indices = @transform_3, window_bounds = array<i64: 16, 256>}]} {
    %c0 = arith.constant 0 : index
    %c0_0 = arith.constant 0 : index
    %0 = vector.load %arg2[%c0, %c0_0] : memref<16x128xbf16, #tpu.memory_space<vmem>>, vector<16x128xbf16>
    %c0_1 = arith.constant 0 : index
    %c0_2 = arith.constant 0 : index
    %1 = vector.load %arg3[%c0_1, %c0_2] : memref<128x256xbf16, #tpu.memory_space<vmem>>, vector<128x256xbf16>
    %cst = arith.constant dense<0.000000e+00> : vector<16x256xf32>
    %2 = tpu.matmul %0, %1, %cst {dimension_numbers = #tpu.dot_dimension_numbers<[1], [0], [0], [1], [0, 0, 1, 1], [], []>} : vector<16x128xbf16>, vector<128x256xbf16>, vector<16x256xf32> -> vector<16x256xf32>
    %c0_3 = arith.constant 0 : index
    %c0_4 = arith.constant 0 : index
    %3 = vector.load %arg4[%c0_3, %c0_4] : memref<1x256xf32, #tpu.memory_space<vmem>>, vector<1x256xf32>
    %4 = vector.broadcast %3 : vector<1x256xf32> to vector<16x256xf32>
    %5 = arith.addf %2, %4 : vector<16x256xf32>
    %6 = arith.truncf %5 : vector<16x256xf32> to vector<16x256xbf16>
    %c0_5 = arith.constant 0 : index
    %c0_6 = arith.constant 0 : index
    %7 = vector.load %arg5[%c0_5, %c0_6] : memref<16x256xbf16, #tpu.memory_space<vmem>>, vector<16x256xbf16>
    tpu.vector_store %arg5[%c0_5, %c0_6], %6 {strides = array<i32>} : memref<16x256xbf16, #tpu.memory_space<vmem>>, vector<16x256xbf16>,
    return
  }
  func.func @transform_0(%arg0: i32, %arg1: i32) -> (i32, i32) {
    %c0_i32 = arith.constant 0 : i32
    %c0_i32_0 = arith.constant 0 : i32
    return %arg0, %c0_i32 : i32, i32
  }
  func.func @transform_1(%arg0: i32, %arg1: i32) -> (i32, i32) {
    %c0_i32 = arith.constant 0 : i32
    %c0_i32_0 = arith.constant 0 : i32
    return %c0_i32, %arg1 : i32, i32
  }
  func.func @transform_2(%arg0: i32, %arg1: i32) -> (i32, i32) {
    %c0_i32 = arith.constant 0 : i32
    %c0_i32_0 = arith.constant 0 : i32
    return %c0_i32, %arg1 : i32, i32
  }
  func.func @transform_3(%arg0: i32, %arg1: i32) -> (i32, i32) {
    %c0_i32 = arith.constant 0 : i32
    return %arg0, %arg1 : i32, i32
  }
}

</mosaic_0001>

<bundles_post_ra>
// kernel: tpu_custom_call.1
= control target key start
LH: loop header
LB: loop body
LE: loop exit
PB: predicated region body
PF: predicated region fallthrough
CT: control target
= control target key end

     0   :  { %s1156_s0 = inlined_call_operand.hbm [shape: bf16[16,128], index: 0, kind: input, shape index: {}]   ;;  %s1157_s1 = inlined_call_operand.hbm [shape: bf16[128,768], index: 1, kind: input, shape index: {}]   ;;  %s1158_s2 = inlined_call_operand.hbm [shape: f32[1,768], index: 2, kind: input, shape index: {}]   ;;  %s1159_s3 = inlined_call_operand.hbm [shape: bf16[16,768], index: 3, kind: output, shape index: {}]  }
   0x1   :  { %1160 = sst [smem:[#allocation12_spill]] %s1156_s0 }
   0x2   :  { %1161 = sst [smem:[#allocation13_spill]] %s1157_s1 }
   0x3   :  { %8 = vsyncpa [#allocation3], 0 }
   0x4   :  { %9 = vsyncpa [#allocation6], 0 }
   0x5   :  { %11 = vsyncpa [#allocation6 + $0x1], 0 }
   0x6   :  { %12 = vsyncpa [#allocation4], 0 }
   0x7   :  { %14 = vsyncpa [#allocation4 + $0x1], 0  ;;  %s950_s12 = smov 0   ;;  %s952_s13 = smov 0  }
   0x8   :  { %s954_s14 = smov 0   ;;  %s956_s15 = smov 0  }
   0x9   :  { %s958_s16 = smov 0   ;;  %s960_s17 = smov 0  }
   0xa LB: > { %s29_s18 = sadd.s32 1, %s915_s16  ;;  %s65_s19 = sadd.s32 1, %s907_s14  ;;  %s919_s17 = sphi %s960_s17, %s20_s17   ;;  %s915_s16 = sphi %s958_s16, %s1174_s16   ;;  %s911_s15 = sphi %s956_s15, %s1173_s15   ;;  %s907_s14 = sphi %s954_s14, %s1172_s14   ;;  %s903_s13 = sphi %s952_s13, %s1171_s13   ;;  %s899_s12 = sphi %s950_s12, %s1170_s12  }
   0xb   : > { %p30_p0 = scmp.ge.s32.totalorder %s29_s18, 3  ;;  %p72_p1 = scmp.ne.s32.totalorder %s907_s14, %s903_s13 }
   0xc   : > { %p73_p2 = scmp.eq.s32.totalorder %s919_s17, 0  ;;  %p683_p4 = scmp.lt.s32.totalorder %s919_s17, 3 }
   0xd   : > { %s1176_s18 = smov (%p30_p0, %s29_s18), 0  ;;  %s173_s22 = sand.u32 1, %s919_s17  }
   0xe   : > { %p990_p3 = por %p73_p2, %p72_p1  ;;  %s62_s21 = ssub.s32 %s915_s16, %s1176_s18 }
   0xf   : > { %p63_p5 = scmp.eq.s32.totalorder %s62_s21, 0  ;;  %s175_s23 = sand.u32 1, %s907_s14  }
  0x10   : > { %s638_s24 = sshll.u32 %s915_s16, 3  ;;  %s555_s26 = sshll.u32 %s175_s23, 7 }
  0x11   : > { %s1001_s25 = scalar_select %p63_p5, %s907_s14, %s65_s19  }
  0x12   : > { %s1163_s1 = sld [smem:[#allocation13_spill]]  ;;  %s177_s4 = scalar_lea.vmem [#allocation5], %s555_s26 }
  0x13   : > { %s185_s5 = sshll.u32 %s177_s4, 4  ;;  %p1012_p6 = pnand %p683_p4, %p990_p3  ;;  %s186_s5 = int_to_ptr.vmem [resolvable:$true] %s185_s5 }
  0x14   : > { %s1016_s7 = scalar_lea.sflag [#allocation6], %s173_s22  ;;  %s921_s8 = smov 384  }
  0x15   : > { %s922_s9 = smov 128   ;;  %s923_s10 = smov 8  }
  0x16   : > { %s1022_s11 = sadd.s32 4294967295, %s919_s17   ;;  %s551_s19 = sadd.s32 4294967294, %s919_s17  }
  0x17   : > { %p78_p7 = scmp.ne.s32.totalorder %s903_s13, %s899_s12  ;;  %p79_p8 = scmp.eq.s32.totalorder %s1022_s11, 0 }
  0x18   : > { %s182_s29 = scalar_lea.hbm %s1163_s1, %s638_s24  ;;  %p130_p9 = scmp.eq.s32.totalorder %s1022_s11, 2 }
  0x19   : > { %s183_s30 = sshll.u32 %s182_s29, 4  ;;  %p136_p10 = scmp.eq.s32.totalorder %s551_s19, 2  ;;  %s184_s30 = int_to_ptr.hbm [resolvable:$true] %s183_s30 }
  0x1a   : > { %674 = dma.hbm_to_vmem [thread:$0]  (!%p1012_p6), %s184_s30, 2048, %s186_s5, %s1016_s7, %s921_s8, %s922_s9, %s923_s10  }
  0x1b   : > { %p1031_p11 = por %p79_p8, %p78_p7  ;;  %p552_p12 = scmp.ge.s32.totalorder %s919_s17, 1 }
  0x1c   : > { %p1039_p13 = por %p130_p9, %p72_p1  ;;  %p1043_p0 = por %p136_p10, %p78_p7 }
  0x1d   : > { %p143_p2 = scmp.lt.s32.totalorder %s919_s17, 4  ;;  %s1168_s0 = sld [smem:[#allocation12_spill]] }
  0x1e   : > { %s924_s29 = smov [#allocation2]   ;;  %s558_s4 = sshll.u32 %s175_s23, 1 }
  0x1f   : > { %p1051_p3 = pnand %p552_p12, %p143_p2  ;;  %s159_s30 = sshll.u32 %s924_s29, 4  ;;  %s160_s30 = int_to_ptr.vmem [resolvable:$true] %s159_s30 }
  0x20   : > { %s559_s5 = sshll.u32 %s915_s16, 1  ;;  %s199_s8 = scalar_lea.vmem [#allocation7], %s558_s4 }
  0x21   : > { %p667_p1 = pneg %p1051_p3  ;;  %s207_s9 = sshll.u32 %s199_s8, 4  ;;  %s208_s9 = int_to_ptr.vmem [resolvable:$true] %s207_s9 }
  0x22   : > { %s203_s24 = scalar_lea.hbm %s1158_s2, %s559_s5  ;;  %s925_s26 = smov 64  }
  0x23   : > { %s157_s27 = sshll.u32 %s1168_s0, 4  ;;  %p668_p4 = pnand %p667_p1, %p79_p8  ;;  %s158_s27 = int_to_ptr.hbm [resolvable:$true] %s157_s27 }
  0x24   : > { %s926_s0 = smov 4   ;;  %s205_s1 = sshll.u32 %s203_s24, 4  ;;  %s206_s1 = int_to_ptr.hbm [resolvable:$true] %s205_s1 }
  0x25   : > { %670 = dma.hbm_to_vmem [thread:$0]  (!%p668_p4), %s158_s27, 128, %s160_s30, [#allocation3], %s925_s26, %s925_s26, %s926_s0  }
  0x26   : > { %677 = dma.hbm_to_vmem [thread:$0]  (!%p1012_p6), %s206_s1, 32, %s208_s9, %s1016_s7  }
  0x27   : > { %216 = sbr.rel (%p1051_p3) target bundleno = 227 (0xe3), region = 32 }
  0x2c   : > { %886 = dma.done.wait (%p79_p8), [#allocation3], 128  }
  0x2d   : > { %888 = vsyncadd (%p79_p8), [#allocation3], 4294967168  ;;  %s223_s23 = sand.u32 1, %s1022_s11   ;;  %s1076_s29 = sand.u32 1, %s903_s13  }
  0x2e   : > { %s562_s0 = sshll.u32 %s1076_s29, 7  ;;  %s224_s27 = scalar_lea.sflag [#allocation6], %s223_s23 }
  0x2f   : > { %s1079_s6 = scalar_lea.vmem [#allocation5], %s562_s0 }
  0x30   : > { %890 = dma.done.wait (%p1031_p11), %s224_s27, 2080  }
  0x31   : > { %892 = vsyncadd (%p1031_p11), %s224_s27, 4294965216  ;;  %v627_v0 = vld [vmem:[%s1079_s6 + $0x70] sm:$0xf]  ;;  %v655_v1 = vld [vmem:[%s1079_s6 + $0x74] sm:$0xf0]  ;;  %s563_s1 = sshll.u32 %s1076_s29, 1 }
  0x32   : > { %v654_v2 = vld [vmem:[%s1079_s6 + $0x74] sm:$0xf]  ;;  %v628_v3 = vor.u32 %v655_v1, %v627_v0  ;;  %v629_v4 = vld [vmem:[%s1079_s6 + $0x78] sm:$0xf0]  ;;  %v619_v5 = vld [vmem:[%s1079_s6 + $0x60] sm:$0xf] }
  0x33   : > { %v653_v6 = vld [vmem:[%s1079_s6 + $0x64] sm:$0xf0]  ;;  %v632_v7 = vor.u32 %v654_v2, %v629_v4  ;;  %v652_v8 = vld [vmem:[%s1079_s6 + $0x64] sm:$0xf]  ;;  %v621_v9 = vld [vmem:[%s1079_s6 + $0x68] sm:$0xf0] }
  0x34   : > { %381 = vmatpush.bf16.msra.mxu0 %v628_v3  ;;  %v620_v10 = vor.u32 %v653_v6, %v619_v5  ;;  %v624_v11 = vor.u32 %v652_v8, %v621_v9  ;;  %v611_v12 = vld [vmem:[%s1079_s6 + $0x50] sm:$0xf]  ;;  %v651_v13 = vld [vmem:[%s1079_s6 + $0x54] sm:$0xf0]  ;;  %v650_v14 = vld [vmem:[%s1079_s6 + $0x54] sm:$0xf] }
  0x35   : > { %395 = vmatpush.bf16.msra.mxu1 %v632_v7  ;;  %v613_v15 = vld [vmem:[%s1079_s6 + $0x58] sm:$0xf0]  ;;  %v612_v16 = vor.u32 %v651_v13, %v611_v12  ;;  %v603_v18 = vld [vmem:[%s1079_s6 + $0x40] sm:$0xf]  ;;  %v649_v19 = vld [vmem:[%s1079_s6 + $0x44] sm:$0xf0] }
  0x36   : > { %v616_v17 = vor.u32 %v650_v14, %v613_v15  ;;  %v648_v20 = vld [vmem:[%s1079_s6 + $0x44] sm:$0xf]  ;;  %v605_v21 = vld [vmem:[%s1079_s6 + $0x48] sm:$0xf0]  ;;  %v604_v22 = vor.u32 %v649_v19, %v603_v18  ;;  %v595_v24 = vld [vmem:[%s1079_s6 + $0x30] sm:$0xf] }
  0x37   : > { %v608_v23 = vor.u32 %v648_v20, %v605_v21  ;;  %v647_v25 = vld [vmem:[%s1079_s6 + $0x34] sm:$0xf0]  ;;  %v646_v26 = vld [vmem:[%s1079_s6 + $0x34] sm:$0xf]  ;;  %v597_v27 = vld [vmem:[%s1079_s6 + $0x38] sm:$0xf0] }
  0x38   : > { %382 = vmatpush.bf16.msra.mxu0 %v620_v10  ;;  %v596_v28 = vor.u32 %v647_v25, %v595_v24  ;;  %v600_v29 = vor.u32 %v646_v26, %v597_v27  ;;  %v587_v30 = vld [vmem:[%s1079_s6 + $0x20] sm:$0xf]  ;;  %v645_v31 = vld [vmem:[%s1079_s6 + $0x24] sm:$0xf0]  ;;  %v644_v32 = vld [vmem:[%s1079_s6 + $0x24] sm:$0xf] }
  0x39   : > { %396 = vmatpush.bf16.msra.mxu1 %v624_v11  ;;  %v589_v33 = vld [vmem:[%s1079_s6 + $0x28] sm:$0xf0]  ;;  %v588_v34 = vor.u32 %v645_v31, %v587_v30  ;;  %v579_v36 = vld [vmem:[%s1079_s6 + $0x10] sm:$0xf]  ;;  %v643_v37 = vld [vmem:[%s1079_s6 + $0x14] sm:$0xf0] }
  0x3a   : > { %v592_v35 = vor.u32 %v644_v32, %v589_v33  ;;  %v642_v38 = vld [vmem:[%s1079_s6 + $0x14] sm:$0xf]  ;;  %v581_v39 = vld [vmem:[%s1079_s6 + $0x18] sm:$0xf0]  ;;  %v580_v40 = vor.u32 %v643_v37, %v579_v36  ;;  %v571_v42 = vld [vmem:[%s1079_s6] sm:$0xf] }
  0x3b   : > { %v584_v41 = vor.u32 %v642_v38, %v581_v39  ;;  %v641_v43 = vld [vmem:[%s1079_s6 + $0x4] sm:$0xf0]  ;;  %v640_v44 = vld [vmem:[%s1079_s6 + $0x4] sm:$0xf]  ;;  %v573_v45 = vld [vmem:[%s1079_s6 + $0x8] sm:$0xf0] }
  0x3c   : > { %383 = vmatpush.bf16.msra.mxu0 %v612_v16  ;;  %v572_v46 = vor.u32 %v641_v43, %v571_v42  ;;  %v576_v47 = vor.u32 %v640_v44, %v573_v45  ;;  %v639_v48 = vld [vmem:[#allocation2] sm:$0xff]  ;;  %s237_s7 = scalar_lea.vmem [#allocation7], %s563_s1  ;;  %s564_s11 = sshll.u32 %s1076_s29, 4 }
  0x3d   : > { %397 = vmatpush.bf16.msra.mxu1 %v616_v17  ;;  %v289_v49 = vld [vmem:[%s237_s7] sm:$0x3]  ;;  %s656_s20 = sshll.u32 %s911_s15, 3  ;;  %s265_s5 = scalar_lea.vmem [#allocation8], %s564_s11 }
  0x3e   : > { %v291_v50 = vperm.slane %v289_v49, 0  ;;  %v292_v51 = vperm.slane %v289_v49, 1  ;;  %s428_s4 = scalar_lea.hbm %s1159_s3, %s656_s20  ;;  %s429_s8 = sshll.u32 %s265_s5, 4  ;;  %s430_s8 = int_to_ptr.vmem [resolvable:$true] %s429_s8 }
  0x3f   : > { %s431_s9 = sshll.u32 %s428_s4, 4  ;;  %s414_s10 = scalar_lea.sflag [#allocation4], %s1076_s29  ;;  %s432_s9 = int_to_ptr.hbm [resolvable:$true] %s431_s9 }
  0x40   : > { %384 = vmatpush.bf16.msra.mxu0 %v604_v22  ;;  %s847_s15 = sshra.s32 %s432_s9, 4  ;;  %s853_s23 = scalar_lea.hbm %s1159_s3, 48  ;;  %s848_s15 = int_to_ptr.hbm [resolvable:$true] %s847_s15 }
  0x41   : > { %398 = vmatpush.bf16.msra.mxu1 %v608_v23  ;;  %s849_s19 = scalar_lea.hbm %s848_s15, 16  ;;  %p854_p8 = scmp.lt.s32.totalorder %s848_s15, %s1159_s3 }
  0x42   : > { %p850_p5 = scmp.ne.s32.totalorder %s848_s15, %s849_s19  ;;  %p855_p9 = scmp.lt.s32.totalorder %s853_s23, %s849_s19 }
  0x44   : > { %385 = vmatpush.bf16.msra.mxu0 %v596_v28  ;;  %p851_p6 = pnand %p850_p5, %p1039_p13  ;;  %p856_p10 = por %p855_p9, %p854_p8 }
  0x45   : > { %399 = vmatpush.bf16.msra.mxu1 %v600_v29 }
  0x46   : > { %p852_p7 = pneg %p851_p6 }
  0x48   : > { %386 = vmatpush.bf16.msra.mxu0 %v588_v34  ;;  %p857_p11 = pnand %p856_p10, %p852_p7 }
  0x49   : > { %400 = vmatpush.bf16.msra.mxu1 %v592_v35 }
  0x4c   : > { %387 = vmatpush.bf16.msra.mxu0 %v580_v40 }
  0x4d   : > { %401 = vmatpush.bf16.msra.mxu1 %v584_v41 }
  0x50   : > { %388 = vmatpush.bf16.msra.mxu0 %v572_v46 }
  0x51   : > { %402 = vmatpush.bf16.msra.mxu1 %v576_v47 }
  0x53   : > { %389 = vmatmul.bf16.vlgmr.msra.gmra.mxu0 %v639_v48 }
  0x54   : > { %403 = vmatmul.bf16.vlgmr.msra.gmra.mxu1 %v639_v48 }
  0xd0   : > { %v390_v52 = vpop.f32.mrf.mxu0 }
  0xd1   : > { %v391_v53 = vadd.f32 %v390_v52, %v291_v50  ;;  %v404_v54 = vpop.f32.mrf.mxu1 }
  0xd2   : > { %v405_v55 = vadd.f32 %v404_v54, %v292_v51 }
  0xd4   : > { %v409_v56 = vpack.c.bf16 %v405_v55, %v391_v53 }
  0xd6   : > { %411 = vst [vmem:[%s265_s5] sm:$0xff] %v409_v56 }
  0xd8   : > { %v392_v57 = vpop.f32.mrf.mxu0 }
  0xd9   : > { %v393_v58 = vadd.f32 %v392_v57, %v291_v50  ;;  %v406_v59 = vpop.f32.mrf.mxu1 }
  0xda   : > { %v407_v60 = vadd.f32 %v406_v59, %v292_v51 }
  0xdc   : > { %v410_v61 = vpack.c.bf16 %v407_v60, %v393_v58 }
  0xde   : > { %412 = vst [vmem:[%s265_s5 + $0x8] sm:$0xff] %v410_v61 }
  0xdf   : > { %860 = shalt.err (!%p857_p11)
}
  0xe0   : > { %s927_s29 = smov 128   ;;  %s928_s6 = smov 384  }
  0xe1   : > { %s929_s1 = smov 8  }
  0xe2   : > { %665 = dma.vmem_to_hbm [thread:$0]  (%p1039_p13), %s430_s8, 256, %s432_s9, %s414_s10, %s927_s29, %s928_s6, %s929_s1  }
  0xe3 PF: > { %p685_p12 = scmp.ge.s32.totalorder %s919_s17, 2  ;;  %s446_s7 = sand.u32 1, %s899_s12  }
  0xe4   : > { %s447_s11 = scalar_lea.sflag [#allocation4], %s446_s7 }
  0xe5   : > { %p679_p2 = pnand %p685_p12, %p1043_p0 }
  0xe7   : > { %p680_p3 = pneg %p679_p2 }
  0xe9   : > { %894 = dma.done.wait (%p680_p3), %s447_s11, 256  }
  0xea   : > { %896 = vsyncadd (%p680_p3), %s447_s11, 4294967040  ;;  %s20_s17 = sadd.s32 1, %s919_s17   ;;  %s1170_s12 = smov %s903_s13 }
  0xeb   : > { %p17_p1 = scmp.ge.s32.totalorder %s20_s17, 5   ;;  %s1171_s13 = smov %s907_s14 }
  0xec   : > { %s1172_s14 = smov %s1001_s25  ;;  %s1173_s15 = smov %s915_s16 }
  0xed   : > { %s1174_s16 = smov %s1176_s18  ;;  %19 = sbr.rel (!%p17_p1) target bundleno = 10 (0xa), region = 94 }
  0xf2   :  { %453 = vsyncpa [#allocation3], 1 }
  0xf3   :  { %455 = vsyncpa [#allocation3 + $0x1], 1 }
  0xf4   :  { %456 = vsyncpa [#allocation6], 1 }
  0xf5   :  { %458 = vsyncpa [#allocation6 + $0x1], 1 }
  0xf6   :  { %459 = vsyncpa [#allocation4], 1 }
  0xf7   :  { %461 = vsyncpa [#allocation4 + $0x1], 1 }

</bundles_post_ra>
